<compile_context>
chip_gen: v7x
topology: tpu7x:2x2x1
jax: 0.10.0
libtpu: 0.0.40
codegen_flags: <defaults>
</compile_context>

<pallas_src>
import numpy as np
import jax
import jax.numpy as jnp
from jax.experimental import pallas as pl
from jax.experimental.pallas import tpu as pltpu


def _pick_tile_hw(hw, c, bytes_per_elem=4, stream_budget_bytes=12 << 20):
    """Largest multiple-of-128 tile of the spatial axis that divides HW, fits the
    double-buffered VMEM budget (3 streamed arrays x 2 buffers), and — when
    possible — leaves >= 2 tiles along HW so the software pipeline / both v7x
    cores have work even for tiny batch sizes."""
    if hw % 128 != 0:
        return hw  # full-extent block is always legal
    fits = [t for t in range(128, hw + 1, 128)
            if hw % t == 0 and 6 * c * t * bytes_per_elem <= stream_budget_bytes]
    if not fits:
        return 128
    multi = [t for t in fits if hw // t >= 2]
    return max(multi) if multi else max(fits)


def _trainer_kernel(a_ref, s_ref, temb_ref, w_ref, x0_ref, real_ref, out_ref):
    """One grid step = one (batch, HW-tile) pair.

    a_ref, s_ref : (B,)  f32 SMEM  -- gathered sqrt_alphas_bar[t], sqrt_one_minus_alphas_bar[t]
    temb_ref     : (B,C) f32 SMEM  -- per-example time embedding (+ conv bias)
    w_ref        : (C,C) f32 SMEM  -- 1x1-conv channel-mix weights
    x0_ref       : (1, C, TILE_HW) f32 VMEM block
    real_ref     : (1, C, TILE_HW) f32 VMEM block
    out_ref      : (1, C, TILE_HW) f32 VMEM block (elementwise squared error)
    """
    b = pl.program_id(0)
    a = a_ref[b]                      # scalar: sqrt(alphas_bar)[t_b]
    s = s_ref[b]                      # scalar: sqrt(1 - alphas_bar)[t_b]

    x0 = x0_ref[0]                    # (C, TILE_HW)
    real = real_ref[0]                # (C, TILE_HW)

    # q_sample: x_t = a * x_0 + s * real_image
    x_t = a * x0 + s * real

    c = x_t.shape[0]
    # Surrogate model(x_t, t): 1x1 conv (channel mix) + per-timestep embedding.
    # C is tiny, so do it as unrolled VPU FMAs with scalar weights from SMEM
    # (free filler under the streaming DMAs; the MXU would add latency only).
    rows = []
    for i in range(c):
        acc = x_t[0:1, :] * w_ref[i, 0]
        for j in range(1, c):
            acc = acc + x_t[j:j + 1, :] * w_ref[i, j]
        pred_i = acc + temb_ref[b, i]
        d = pred_i - real[i:i + 1, :]
        rows.append(d * d)            # F.mse_loss(pred, real, reduction='none')

    # One lane-dense (C, TILE_HW) store instead of C partial sublane stores.
    out_ref[0] = jnp.concatenate(rows, axis=0).astype(out_ref.dtype)


class GaussianDiffusionTrainer:
    def __init__(self, beta_1, beta_T, T, channels):
        self.T = T
        # Buffers computed in float64 exactly as torch.linspace(...).double() etc.,
        # then cast to float32 (matches extract()'s .float()).
        betas = np.linspace(beta_1, beta_T, T, dtype=np.float64)
        alphas = 1.0 - betas
        alphas_bar = np.cumprod(alphas)
        self.sqrt_alphas_bar = jnp.asarray(np.sqrt(alphas_bar), dtype=jnp.float32)
        self.sqrt_one_minus_alphas_bar = jnp.asarray(
            np.sqrt(1.0 - alphas_bar), dtype=jnp.float32)

        # Deterministic synthetic model parameters (surrogate for the UNet).
        k1, k2, k3 = jax.random.split(jax.random.PRNGKey(42), 3)
        self.w = jax.random.normal(k1, (channels, channels), jnp.float32) * 0.1
        self.bias = jax.random.normal(k2, (channels,), jnp.float32) * 0.01
        self.temb_table = jax.random.normal(k3, (T, channels), jnp.float32) * 0.01

    def forward(self, key, x_0, real_image):
        B, C, H, W = x_0.shape
        HW = H * W
        tile_hw = _pick_tile_hw(HW, C)
        num_hw_tiles = HW // tile_hw

        # t = torch.randint(T, size=(B,))
        t = jax.random.randint(key, (B,), 0, self.T)

        # extract(): gather coefficients at timesteps t (tiny glue, stays in XLA)
        a_t = jnp.take(self.sqrt_alphas_bar, t, axis=0)            # (B,)
        s_t = jnp.take(self.sqrt_one_minus_alphas_bar, t, axis=0)  # (B,)

        # Per-example time embedding (+ conv bias folded in); scalars -> SMEM.
        temb_t = jnp.take(self.temb_table, t, axis=0) + self.bias  # (B, C)

        x0_flat = x_0.reshape(B, C, HW)
        real_flat = real_image.reshape(B, C, HW)

        # Explicit VMEM limit derived from the tile (safe on 64 MiB v7x parts).
        stream_bytes = C * tile_hw * 4
        vmem_limit = int(min(max(16 * stream_bytes, 4 << 20), 32 << 20))

        loss_flat = pl.pallas_call(
            _trainer_kernel,
            out_shape=jax.ShapeDtypeStruct((B, C, HW), jnp.float32),
            grid=(B, num_hw_tiles),
            in_specs=[
                pl.BlockSpec(memory_space=pltpu.MemorySpace.SMEM),      # a_t  (B,)
                pl.BlockSpec(memory_space=pltpu.MemorySpace.SMEM),      # s_t  (B,)
                pl.BlockSpec(memory_space=pltpu.MemorySpace.SMEM),      # temb (B,C)
                pl.BlockSpec(memory_space=pltpu.MemorySpace.SMEM),      # w    (C,C)
                pl.BlockSpec((1, C, tile_hw), lambda b, h: (b, 0, h)),  # x_0
                pl.BlockSpec((1, C, tile_hw), lambda b, h: (b, 0, h)),  # real_image
            ],
            out_specs=pl.BlockSpec((1, C, tile_hw), lambda b, h: (b, 0, h)),
            compiler_params=pltpu.CompilerParams(
                dimension_semantics=("parallel", "parallel"),
                vmem_limit_bytes=vmem_limit),
        )(a_t, s_t, temb_t, self.w, x0_flat, real_flat)

        # The PyTorch forward computes loss.sum() but never uses it (the module
        # returns the unreduced loss), so the dead reduction is omitted here.
        return loss_flat.reshape(B, C, H, W)


if __name__ == "__main__":
    B, C, H, W = 2, 4, 16, 16
    key = jax.random.PRNGKey(0)
    k_x0, k_real, k_t = jax.random.split(key, 3)

    x_0 = jax.random.normal(k_x0, (B, C, H, W), jnp.float32)
    real_image = jax.random.normal(k_real, (B, C, H, W), jnp.float32)

    trainer = GaussianDiffusionTrainer(beta_1=1e-4, beta_T=0.02, T=1000, channels=C)
    loss = trainer.forward(k_t, x_0, real_image)
    loss = jax.block_until_ready(loss)

    assert loss.shape == (B, C, H, W)
    assert loss.dtype == jnp.float32
    assert bool(jnp.all(loss >= 0.0))
    print("KERNEL_OK")
</pallas_src>

<mosaic_0001>
module attributes {stable_mosaic.version = 11 : i64} {
  func.func @_trainer_kernel(%arg0: i32, %arg1: i32, %arg2: memref<2xf32, #tpu.memory_space<smem>>, %arg3: memref<2xf32, #tpu.memory_space<smem>>, %arg4: memref<2x4xf32, #tpu.memory_space<smem>>, %arg5: memref<4x4xf32, #tpu.memory_space<smem>>, %arg6: memref<1x4x128xf32, #tpu.memory_space<vmem>>, %arg7: memref<1x4x128xf32, #tpu.memory_space<vmem>>, %arg8: memref<1x4x128xf32, #tpu.memory_space<vmem>>) attributes {dimension_semantics = [#tpu.dimension_semantics<parallel>, #tpu.dimension_semantics<parallel>], iteration_bounds = array<i64: 2, 2>, scalar_prefetch = 0 : i64, scratch_operands = 0 : i64, tpu.core_type = #tpu.core_type<tc>, window_params = [{transform_indices = @transform_0, window_bounds = array<i64: 2>}, {transform_indices = @transform_1, window_bounds = array<i64: 2>}, {transform_indices = @transform_2, window_bounds = array<i64: 2, 4>}, {transform_indices = @transform_3, window_bounds = array<i64: 4, 4>}, {transform_indices = @transform_4, window_bounds = array<i64: 1, 4, 128>}, {transform_indices = @transform_5, window_bounds = array<i64: 1, 4, 128>}, {transform_indices = @transform_6, window_bounds = array<i64: 1, 4, 128>}]} {
    %0 = arith.index_cast %arg0 : i32 to index
    %1 = memref.load %arg2[%0] : memref<2xf32, #tpu.memory_space<smem>>
    %2 = arith.index_cast %arg0 : i32 to index
    %3 = memref.load %arg3[%2] : memref<2xf32, #tpu.memory_space<smem>>
    %c0 = arith.constant 0 : index
    %c0_0 = arith.constant 0 : index
    %c0_1 = arith.constant 0 : index
    %4 = vector.load %arg6[%c0, %c0_0, %c0_1] : memref<1x4x128xf32, #tpu.memory_space<vmem>>, vector<1x4x128xf32>
    %5 = vector.shape_cast %4 : vector<1x4x128xf32> to vector<4x128xf32>
    %c0_2 = arith.constant 0 : index
    %c0_3 = arith.constant 0 : index
    %c0_4 = arith.constant 0 : index
    %6 = vector.load %arg7[%c0_2, %c0_3, %c0_4] : memref<1x4x128xf32, #tpu.memory_space<vmem>>, vector<1x4x128xf32>
    %7 = vector.shape_cast %6 : vector<1x4x128xf32> to vector<4x128xf32>
    %8 = vector.broadcast %1 : f32 to vector<4x128xf32>
    %9 = arith.mulf %8, %5 : vector<4x128xf32>
    %10 = vector.broadcast %3 : f32 to vector<4x128xf32>
    %11 = arith.mulf %10, %7 : vector<4x128xf32>
    %12 = arith.addf %9, %11 : vector<4x128xf32>
    %13 = vector.extract_strided_slice %12 {offsets = [0, 0], sizes = [1, 128], strides = [1, 1]} : vector<4x128xf32> to vector<1x128xf32>
    %c0_5 = arith.constant 0 : index
    %c0_6 = arith.constant 0 : index
    %14 = memref.load %arg5[%c0_5, %c0_6] : memref<4x4xf32, #tpu.memory_space<smem>>
    %15 = vector.broadcast %14 : f32 to vector<1x128xf32>
    %16 = arith.mulf %13, %15 : vector<1x128xf32>
    %17 = vector.extract_strided_slice %12 {offsets = [1, 0], sizes = [1, 128], strides = [1, 1]} : vector<4x128xf32> to vector<1x128xf32>
    %c0_7 = arith.constant 0 : index
    %c1 = arith.constant 1 : index
    %18 = memref.load %arg5[%c0_7, %c1] : memref<4x4xf32, #tpu.memory_space<smem>>
    %19 = vector.broadcast %18 : f32 to vector<1x128xf32>
    %20 = arith.mulf %17, %19 : vector<1x128xf32>
    %21 = arith.addf %16, %20 : vector<1x128xf32>
    %22 = vector.extract_strided_slice %12 {offsets = [2, 0], sizes = [1, 128], strides = [1, 1]} : vector<4x128xf32> to vector<1x128xf32>
    %c0_8 = arith.constant 0 : index
    %c2 = arith.constant 2 : index
    %23 = memref.load %arg5[%c0_8, %c2] : memref<4x4xf32, #tpu.memory_space<smem>>
    %24 = vector.broadcast %23 : f32 to vector<1x128xf32>
    %25 = arith.mulf %22, %24 : vector<1x128xf32>
    %26 = arith.addf %21, %25 : vector<1x128xf32>
    %27 = vector.extract_strided_slice %12 {offsets = [3, 0], sizes = [1, 128], strides = [1, 1]} : vector<4x128xf32> to vector<1x128xf32>
    %c0_9 = arith.constant 0 : index
    %c3 = arith.constant 3 : index
    %28 = memref.load %arg5[%c0_9, %c3] : memref<4x4xf32, #tpu.memory_space<smem>>
    %29 = vector.broadcast %28 : f32 to vector<1x128xf32>
    %30 = arith.mulf %27, %29 : vector<1x128xf32>
    %31 = arith.addf %26, %30 : vector<1x128xf32>
    %32 = arith.index_cast %arg0 : i32 to index
    %c0_10 = arith.constant 0 : index
    %33 = memref.load %arg4[%32, %c0_10] : memref<2x4xf32, #tpu.memory_space<smem>>
    %34 = vector.broadcast %33 : f32 to vector<1x128xf32>
    %35 = arith.addf %31, %34 : vector<1x128xf32>
    %36 = vector.extract_strided_slice %7 {offsets = [0, 0], sizes = [1, 128], strides = [1, 1]} : vector<4x128xf32> to vector<1x128xf32>
    %37 = arith.subf %35, %36 : vector<1x128xf32>
    %38 = arith.mulf %37, %37 : vector<1x128xf32>
    %39 = vector.extract_strided_slice %12 {offsets = [0, 0], sizes = [1, 128], strides = [1, 1]} : vector<4x128xf32> to vector<1x128xf32>
    %c1_11 = arith.constant 1 : index
    %c0_12 = arith.constant 0 : index
    %40 = memref.load %arg5[%c1_11, %c0_12] : memref<4x4xf32, #tpu.memory_space<smem>>
    %41 = vector.broadcast %40 : f32 to vector<1x128xf32>
    %42 = arith.mulf %39, %41 : vector<1x128xf32>
    %43 = vector.extract_strided_slice %12 {offsets = [1, 0], sizes = [1, 128], strides = [1, 1]} : vector<4x128xf32> to vector<1x128xf32>
    %c1_13 = arith.constant 1 : index
    %c1_14 = arith.constant 1 : index
    %44 = memref.load %arg5[%c1_13, %c1_14] : memref<4x4xf32, #tpu.memory_space<smem>>
    %45 = vector.broadcast %44 : f32 to vector<1x128xf32>
    %46 = arith.mulf %43, %45 : vector<1x128xf32>
    %47 = arith.addf %42, %46 : vector<1x128xf32>
    %48 = vector.extract_strided_slice %12 {offsets = [2, 0], sizes = [1, 128], strides = [1, 1]} : vector<4x128xf32> to vector<1x128xf32>
    %c1_15 = arith.constant 1 : index
    %c2_16 = arith.constant 2 : index
    %49 = memref.load %arg5[%c1_15, %c2_16] : memref<4x4xf32, #tpu.memory_space<smem>>
    %50 = vector.broadcast %49 : f32 to vector<1x128xf32>
    %51 = arith.mulf %48, %50 : vector<1x128xf32>
    %52 = arith.addf %47, %51 : vector<1x128xf32>
    %53 = vector.extract_strided_slice %12 {offsets = [3, 0], sizes = [1, 128], strides = [1, 1]} : vector<4x128xf32> to vector<1x128xf32>
    %c1_17 = arith.constant 1 : index
    %c3_18 = arith.constant 3 : index
    %54 = memref.load %arg5[%c1_17, %c3_18] : memref<4x4xf32, #tpu.memory_space<smem>>
    %55 = vector.broadcast %54 : f32 to vector<1x128xf32>
    %56 = arith.mulf %53, %55 : vector<1x128xf32>
    %57 = arith.addf %52, %56 : vector<1x128xf32>
    %58 = arith.index_cast %arg0 : i32 to index
    %c1_19 = arith.constant 1 : index
    %59 = memref.load %arg4[%58, %c1_19] : memref<2x4xf32, #tpu.memory_space<smem>>
    %60 = vector.broadcast %59 : f32 to vector<1x128xf32>
    %61 = arith.addf %57, %60 : vector<1x128xf32>
    %62 = vector.extract_strided_slice %7 {offsets = [1, 0], sizes = [1, 128], strides = [1, 1]} : vector<4x128xf32> to vector<1x128xf32>
    %63 = arith.subf %61, %62 : vector<1x128xf32>
    %64 = arith.mulf %63, %63 : vector<1x128xf32>
    %65 = vector.extract_strided_slice %12 {offsets = [0, 0], sizes = [1, 128], strides = [1, 1]} : vector<4x128xf32> to vector<1x128xf32>
    %c2_20 = arith.constant 2 : index
    %c0_21 = arith.constant 0 : index
    %66 = memref.load %arg5[%c2_20, %c0_21] : memref<4x4xf32, #tpu.memory_space<smem>>
    %67 = vector.broadcast %66 : f32 to vector<1x128xf32>
    %68 = arith.mulf %65, %67 : vector<1x128xf32>
    %69 = vector.extract_strided_slice %12 {offsets = [1, 0], sizes = [1, 128], strides = [1, 1]} : vector<4x128xf32> to vector<1x128xf32>
    %c2_22 = arith.constant 2 : index
    %c1_23 = arith.constant 1 : index
    %70 = memref.load %arg5[%c2_22, %c1_23] : memref<4x4xf32, #tpu.memory_space<smem>>
    %71 = vector.broadcast %70 : f32 to vector<1x128xf32>
    %72 = arith.mulf %69, %71 : vector<1x128xf32>
    %73 = arith.addf %68, %72 : vector<1x128xf32>
    %74 = vector.extract_strided_slice %12 {offsets = [2, 0], sizes = [1, 128], strides = [1, 1]} : vector<4x128xf32> to vector<1x128xf32>
    %c2_24 = arith.constant 2 : index
    %c2_25 = arith.constant 2 : index
    %75 = memref.load %arg5[%c2_24, %c2_25] : memref<4x4xf32, #tpu.memory_space<smem>>
    %76 = vector.broadcast %75 : f32 to vector<1x128xf32>
    %77 = arith.mulf %74, %76 : vector<1x128xf32>
    %78 = arith.addf %73, %77 : vector<1x128xf32>
    %79 = vector.extract_strided_slice %12 {offsets = [3, 0], sizes = [1, 128], strides = [1, 1]} : vector<4x128xf32> to vector<1x128xf32>
    %c2_26 = arith.constant 2 : index
    %c3_27 = arith.constant 3 : index
    %80 = memref.load %arg5[%c2_26, %c3_27] : memref<4x4xf32, #tpu.memory_space<smem>>
    %81 = vector.broadcast %80 : f32 to vector<1x128xf32>
    %82 = arith.mulf %79, %81 : vector<1x128xf32>
    %83 = arith.addf %78, %82 : vector<1x128xf32>
    %84 = arith.index_cast %arg0 : i32 to index
    %c2_28 = arith.constant 2 : index
    %85 = memref.load %arg4[%84, %c2_28] : memref<2x4xf32, #tpu.memory_space<smem>>
    %86 = vector.broadcast %85 : f32 to vector<1x128xf32>
    %87 = arith.addf %83, %86 : vector<1x128xf32>
    %88 = vector.extract_strided_slice %7 {offsets = [2, 0], sizes = [1, 128], strides = [1, 1]} : vector<4x128xf32> to vector<1x128xf32>
    %89 = arith.subf %87, %88 : vector<1x128xf32>
    %90 = arith.mulf %89, %89 : vector<1x128xf32>
    %91 = vector.extract_strided_slice %12 {offsets = [0, 0], sizes = [1, 128], strides = [1, 1]} : vector<4x128xf32> to vector<1x128xf32>
    %c3_29 = arith.constant 3 : index
    %c0_30 = arith.constant 0 : index
    %92 = memref.load %arg5[%c3_29, %c0_30] : memref<4x4xf32, #tpu.memory_space<smem>>
    %93 = vector.broadcast %92 : f32 to vector<1x128xf32>
    %94 = arith.mulf %91, %93 : vector<1x128xf32>
    %95 = vector.extract_strided_slice %12 {offsets = [1, 0], sizes = [1, 128], strides = [1, 1]} : vector<4x128xf32> to vector<1x128xf32>
    %c3_31 = arith.constant 3 : index
    %c1_32 = arith.constant 1 : index
    %96 = memref.load %arg5[%c3_31, %c1_32] : memref<4x4xf32, #tpu.memory_space<smem>>
    %97 = vector.broadcast %96 : f32 to vector<1x128xf32>
    %98 = arith.mulf %95, %97 : vector<1x128xf32>
    %99 = arith.addf %94, %98 : vector<1x128xf32>
    %100 = vector.extract_strided_slice %12 {offsets = [2, 0], sizes = [1, 128], strides = [1, 1]} : vector<4x128xf32> to vector<1x128xf32>
    %c3_33 = arith.constant 3 : index
    %c2_34 = arith.constant 2 : index
    %101 = memref.load %arg5[%c3_33, %c2_34] : memref<4x4xf32, #tpu.memory_space<smem>>
    %102 = vector.broadcast %101 : f32 to vector<1x128xf32>
    %103 = arith.mulf %100, %102 : vector<1x128xf32>
    %104 = arith.addf %99, %103 : vector<1x128xf32>
    %105 = vector.extract_strided_slice %12 {offsets = [3, 0], sizes = [1, 128], strides = [1, 1]} : vector<4x128xf32> to vector<1x128xf32>
    %c3_35 = arith.constant 3 : index
    %c3_36 = arith.constant 3 : index
    %106 = memref.load %arg5[%c3_35, %c3_36] : memref<4x4xf32, #tpu.memory_space<smem>>
    %107 = vector.broadcast %106 : f32 to vector<1x128xf32>
    %108 = arith.mulf %105, %107 : vector<1x128xf32>
    %109 = arith.addf %104, %108 : vector<1x128xf32>
    %110 = arith.index_cast %arg0 : i32 to index
    %c3_37 = arith.constant 3 : index
    %111 = memref.load %arg4[%110, %c3_37] : memref<2x4xf32, #tpu.memory_space<smem>>
    %112 = vector.broadcast %111 : f32 to vector<1x128xf32>
    %113 = arith.addf %109, %112 : vector<1x128xf32>
    %114 = vector.extract_strided_slice %7 {offsets = [3, 0], sizes = [1, 128], strides = [1, 1]} : vector<4x128xf32> to vector<1x128xf32>
    %115 = arith.subf %113, %114 : vector<1x128xf32>
    %116 = arith.mulf %115, %115 : vector<1x128xf32>
    %117 = tpu.concatenate %38, %64, %90, %116 in 0 : vector<1x128xf32>, vector<1x128xf32>, vector<1x128xf32>, vector<1x128xf32> -> vector<4x128xf32>
    %c0_38 = arith.constant 0 : index
    %c0_39 = arith.constant 0 : index
    %c0_40 = arith.constant 0 : index
    %118 = vector.load %arg8[%c0_38, %c0_39, %c0_40] : memref<1x4x128xf32, #tpu.memory_space<vmem>>, vector<1x4x128xf32>
    %119 = vector.shape_cast %118 : vector<1x4x128xf32> to vector<4x128xf32>
    %120 = vector.shape_cast %117 : vector<4x128xf32> to vector<1x4x128xf32>
    tpu.vector_store %arg8[%c0_38, %c0_39, %c0_40], %120 {strides = array<i32>} : memref<1x4x128xf32, #tpu.memory_space<vmem>>, vector<1x4x128xf32>,
    return
  }
  func.func @transform_0(%arg0: i32, %arg1: i32) -> i32 {
    %c0_i32 = arith.constant 0 : i32
    %c0_i32_0 = arith.constant 0 : i32
    return %c0_i32 : i32
  }
  func.func @transform_1(%arg0: i32, %arg1: i32) -> i32 {
    %c0_i32 = arith.constant 0 : i32
    %c0_i32_0 = arith.constant 0 : i32
    return %c0_i32 : i32
  }
  func.func @transform_2(%arg0: i32, %arg1: i32) -> (i32, i32) {
    %c0_i32 = arith.constant 0 : i32
    %c0_i32_0 = arith.constant 0 : i32
    %c0_i32_1 = arith.constant 0 : i32
    return %c0_i32, %c0_i32_0 : i32, i32
  }
  func.func @transform_3(%arg0: i32, %arg1: i32) -> (i32, i32) {
    %c0_i32 = arith.constant 0 : i32
    %c0_i32_0 = arith.constant 0 : i32
    %c0_i32_1 = arith.constant 0 : i32
    return %c0_i32, %c0_i32_0 : i32, i32
  }
  func.func @transform_4(%arg0: i32, %arg1: i32) -> (i32, i32, i32) {
    %c0_i32 = arith.constant 0 : i32
    %c0_i32_0 = arith.constant 0 : i32
    return %arg0, %c0_i32, %arg1 : i32, i32, i32
  }
  func.func @transform_5(%arg0: i32, %arg1: i32) -> (i32, i32, i32) {
    %c0_i32 = arith.constant 0 : i32
    %c0_i32_0 = arith.constant 0 : i32
    return %arg0, %c0_i32, %arg1 : i32, i32, i32
  }
  func.func @transform_6(%arg0: i32, %arg1: i32) -> (i32, i32, i32) {
    %c0_i32 = arith.constant 0 : i32
    %c0_i32_0 = arith.constant 0 : i32
    return %arg0, %c0_i32, %arg1 : i32, i32, i32
  }
}

</mosaic_0001>

<bundles_post_ra>
// kernel: tpu_custom_call.1
= control target key start
LH: loop header
LB: loop body
LE: loop exit
PB: predicated region body
PF: predicated region fallthrough
CT: control target
= control target key end

     0   :  { %s1468_s0 = inlined_call_operand.hbm [shape: f32[2], index: 0, kind: input, shape index: {}]   ;;  %s1469_s1 = inlined_call_operand.hbm [shape: f32[2], index: 1, kind: input, shape index: {}]   ;;  %s1470_s2 = inlined_call_operand.vmem [shape: f32[2,4], index: 2, kind: input, shape index: {}]   ;;  %s1471_s3 = inlined_call_operand.hbm [shape: f32[4,4], index: 3, kind: input, shape index: {}]   ;;  %s1472_s4 = inlined_call_operand.hbm [shape: f32[2,4,256], index: 4, kind: input, shape index: {}]   ;;  %s1473_s5 = inlined_call_operand.vmem [shape: f32[2,4,256], index: 5, kind: input, shape index: {}]   ;;  %s1474_s6 = inlined_call_operand.hbm [shape: f32[2,4,256], index: 6, kind: output, shape index: {}]  }
   0x1   :  { %1481 = sst [smem:[#allocation20_spill]] %s1468_s0 }
   0x2   :  { %1482 = sst [smem:[#allocation21_spill]] %s1469_s1 }
   0x3   :  { %1483 = sst [smem:[#allocation22_spill]] %s1470_s2 }
   0x4   :  { %1484 = sst [smem:[#allocation23_spill]] %s1471_s3 }
   0x5   :  { %1485 = sst [smem:[#allocation24_spill]] %s1472_s4 }
   0x6   :  { %11 = vsyncpa [#allocation5], 0 }
   0x7   :  { %12 = vsyncpa [#allocation8], 0 }
   0x8   :  { %13 = vsyncpa [#allocation6], 0 }
   0x9   :  { %14 = vsyncpa [#allocation3], 0 }
   0xa   :  { %16 = vsyncpa [#allocation3 + $0x1], 0 }
   0xb   :  { %17 = vsyncpa [#allocation4], 0 }
   0xc   :  { %19 = vsyncpa [#allocation4 + $0x1], 0  ;;  %s1077_s21 = smov 0   ;;  %s1079_s22 = smov 0  }
   0xd   :  { %s1081_s23 = smov 0   ;;  %s1083_s24 = smov 0  }
   0xe   :  { %s1085_s25 = smov 0   ;;  %s1087_s26 = smov 0  }
   0xf   :  { %s1089_s27 = smov 0   ;;  %s1091_s28 = smov 0  }
  0x10 LB: > { %s676_s29 = sadd.s32 4294967295, %s1034_s28   ;;  %p678_p0 = scmp.ge.s32.totalorder %s1034_s28, 1  ;;  %s1034_s28 = sphi %s1091_s28, %s25_s28   ;;  %s1030_s27 = sphi %s1089_s27, %s1512_s27   ;;  %s1026_s26 = sphi %s1087_s26, %s1511_s26   ;;  %s1022_s25 = sphi %s1085_s25, %s1510_s25   ;;  %s1018_s24 = sphi %s1083_s24, %s1509_s24   ;;  %s1014_s23 = sphi %s1081_s23, %s1508_s23   ;;  %s1010_s22 = sphi %s1079_s22, %s1507_s22   ;;  %s1006_s21 = sphi %s1077_s21, %s1506_s21  }
  0x11   : > { %p1121_p1 = scmp.eq.s32.totalorder %s676_s29, 0  ;;  %p210_p2 = scmp.lt.s32.totalorder %s1034_s28, 5 }
  0x12   : > { %s1488_s2 = sld [smem:[#allocation22_spill]]  ;;  %s1490_s1 = sld [smem:[#allocation21_spill]] }
  0x13   : > { %s1486_s30 = scalar_select %p1121_p1, 1, 0 }
  0x14   : > { %p1126_p3 = pnand %p678_p0, %p210_p2 }
  0x16   : > { %p737_p4 = pneg %p1126_p3 }
  0x18   : > { %s241_s10 = sshll.u32 %s1488_s2, 4  ;;  %p1137_p5 = pnand %p737_p4, %p1121_p1  ;;  %s1141_s10 = int_to_ptr.vmem [resolvable:$true] %s241_s10 }
  0x19   : > { %s836_s14 = scalar_lea.hbm %s1490_s1, 16 }
  0x1a   : > { %p837_p6 = scmp.ne.s32.totalorder %s1490_s1, %s836_s14  ;;  %p838_p7 = pneg %p1137_p5 }
  0x1b   : > { %p843_p10 = scmp.lt.u32.totalorder %s836_s14, %s1490_s1 }
  0x1c   : > { %p839_p8 = pnand %p838_p7, %p837_p6 }
  0x1e   : > { %p840_p9 = pneg %p839_p8 }
  0x20   : > { %p845_p11 = pnand %p843_p10, %p840_p9 }
  0x22   : > { %848 = shalt.err (!%p845_p11)
}
  0x23   : > { %s1036_s19 = smov [#allocation7]   ;;  %s1491_s0 = sld [smem:[#allocation20_spill]] }
  0x24   : > { %743 = dma.hbm_to_smem (!%p1137_p5), %s1490_s1, 16, %s1036_s19, [#allocation8]  }
  0x29   : > { %s849_s13 = scalar_lea.hbm %s1491_s0, 16 }
  0x2a   : > { %p850_p12 = scmp.ne.s32.totalorder %s1491_s0, %s849_s13  ;;  %p856_p2 = scmp.lt.u32.totalorder %s849_s13, %s1491_s0 }
  0x2c   : > { %p852_p13 = pnand %p850_p12, %p838_p7 }
  0x2e   : > { %p853_p0 = pneg %p852_p13 }
  0x30   : > { %p858_p4 = pnand %p856_p2, %p853_p0 }
  0x32   : > { %861 = shalt.err (!%p858_p4)
}
  0x33   : > { %s1037_s18 = smov [#allocation2]   ;;  %s862_s8 = scalar_lea.vmem %s1141_s10, 32 }
  0x34   : > { %740 = dma.hbm_to_smem (!%p1137_p5), %s1491_s0, 16, %s1037_s18, [#allocation5]  }
  0x35   : > { %p863_p6 = scmp.ne.s32.totalorder %s1141_s10, %s862_s8  ;;  %p870_p10 = scmp.lt.s32.totalorder %s1141_s10, %s1141_s10 }
  0x36   : > { %p871_p11 = scmp.lt.s32.totalorder %s862_s8, %s862_s8 }
  0x37   : > { %p865_p8 = pnand %p863_p6, %p838_p7 }
  0x38   : > { %p872_p12 = por %p871_p11, %p870_p10 }
  0x39   : > { %p866_p9 = pneg %p865_p8 }
  0x3b   : > { %p873_p13 = pnand %p872_p12, %p866_p9 }
  0x3d   : > { %876 = shalt.err (!%p873_p13)
}
  0x3e   : > { %s1038_s9 = smov [#allocation9]   ;;  %s1492_s3 = sld [smem:[#allocation23_spill]] }
  0x3f   : > { %746 = dma.vmem_to_smem (!%p1137_p5), %s1141_s10, 32, %s1038_s9, [#allocation6]  }
  0x44   : > { %s877_s15 = scalar_lea.hbm %s1492_s3, 64 }
  0x45   : > { %p878_p0 = scmp.ne.s32.totalorder %s1492_s3, %s877_s15  ;;  %p884_p6 = scmp.lt.u32.totalorder %s877_s15, %s1492_s3 }
  0x47   : > { %p880_p2 = pnand %p878_p0, %p838_p7 }
  0x49   : > { %p881_p4 = pneg %p880_p2 }
  0x4b   : > { %p886_p8 = pnand %p884_p6, %p881_p4 }
  0x4d   : > { %889 = shalt.err (!%p886_p8)
}
  0x4e   : > { %s1039_s19 = smov [#allocation10]   ;;  %s34_s8 = sadd.s32 1, %s1026_s26 }
  0x4f   : > { %749 = dma.hbm_to_smem (!%p1137_p5), %s1492_s3, 64, %s1039_s19, [#allocation8]  }
  0x50   : > { %p35_p7 = scmp.ge.s32.totalorder %s34_s8, 2  ;;  %s37_s11 = sadd.s32 1, %s1030_s27 }
  0x51   : > { %s677_s9 = sadd.s32 4294967294, %s1034_s28   ;;  %s130_s12 = sadd.s32 1, %s1014_s23 }
  0x52   : > { %s1514_s8 = smov (%p35_p7, %s34_s8), 0  ;;  %s1516_s11 = smov (!%p35_p7, %s37_s11), %s1030_s27 }
  0x53   : > { %s126_s13 = ssub.s32 %s1026_s26, %s1514_s8  ;;  %p137_p9 = scmp.ne.s32.totalorder %s1014_s23, %s1010_s22 }
  0x54   : > { %p39_p10 = scmp.ge.s32.totalorder %s1516_s11, 2  ;;  %p143_p11 = scmp.ne.s32.totalorder %s1010_s22, %s1006_s21 }
  0x55   : > { %p138_p12 = scmp.eq.s32.totalorder %s1034_s28, 0  ;;  %p197_p5 = scmp.eq.s32.totalorder %s676_s29, 3 }
  0x56   : > { %s1518_s11 = smov (%p39_p10, %s1516_s11), 0  ;;  %p1226_p13 = por %p1121_p1, %p143_p11 }
  0x57   : > { %1493 = sst [smem:[#allocation19_spill]] %s1518_s11  ;;  %p1230_p0 = por %p197_p5, %p137_p9 }
  0x58   : > { %s1494_s15 = scalar_select %p1226_p13, 1, 0 }
  0x59   : > { %s1495_s16 = scalar_select %p1230_p0, 1, 0 }
  0x5a   : > { %s125_s14 = ssub.s32 %s1030_s27, %s1518_s11  ;;  %p203_p2 = scmp.eq.s32.totalorder %s677_s9, 3 }
  0x5b   : > { %s127_s17 = sor.u32 %s126_s13, %s125_s14  ;;  %p1236_p4 = por %p138_p12, %p137_p9 }
  0x5c   : > { %p128_p6 = scmp.eq.s32.totalorder %s127_s17, 0  ;;  %p1240_p8 = por %p203_p2, %p143_p11 }
  0x5d   : > { %s261_s19 = sand.u32 1, %s1014_s23   ;;  %s685_s10 = sshll.u32 %s1030_s27, 1 }
  0x5e   : > { %s1497_s29 = scalar_select %p1240_p8, 1, 0 }
  0x5f   : > { %s1247_s20 = scalar_select %p128_p6, %s1014_s23, %s130_s12  }
  0x60   : > { %p762_p7 = scmp.lt.s32.totalorder %s1034_s28, 4  ;;  %s684_s0 = sshll.u32 %s261_s19, 2 }
  0x61   : > { %s270_s1 = sadd.s32 %s1026_s26, %s685_s10  ;;  %s265_s9 = scalar_lea.vmem [#allocation11], %s684_s0 }
  0x62   : > { %s686_s2 = sshll.u32 %s270_s1, 6  ;;  %s274_s13 = sshll.u32 %s265_s9, 4  ;;  %s1256_s13 = int_to_ptr.vmem [resolvable:$true] %s274_s13 }
  0x63   : > { %s1498_s4 = sld [smem:[#allocation24_spill]]  ;;  %p1260_p9 = pnand %p762_p7, %p1236_p4 }
  0x64   : > { %s262_s0 = scalar_lea.sflag [#allocation3], %s261_s19 }
  0x65   : > { %p892_p11 = pneg %p1260_p9 }
  0x69   : > { %s1254_s11 = scalar_lea.hbm %s1498_s4, %s686_s2  ;;  %s895_s17 = scalar_lea.hbm %s1498_s4, 256 }
  0x6a   : > { %s890_s1 = scalar_lea.hbm %s1254_s11, 64  ;;  %p896_p2 = scmp.lt.u32.totalorder %s1254_s11, %s1498_s4 }
  0x6b   : > { %p891_p10 = scmp.ne.s32.totalorder %s1254_s11, %s890_s1  ;;  %p897_p4 = scmp.lt.u32.totalorder %s895_s17, %s890_s1 }
  0x6c   : > { %p899_p7 = scmp.lt.u32.totalorder %s890_s1, %s1254_s11 }
  0x6d   : > { %p893_p12 = pnand %p892_p11, %p891_p10  ;;  %p898_p6 = por %p897_p4, %p896_p2 }
  0x6f   : > { %p894_p5 = pneg %p893_p12  ;;  %p900_p8 = por %p899_p7, %p898_p6 }
  0x71   : > { %p901_p0 = pnand %p900_p8, %p894_p5 }
  0x73   : > { %904 = shalt.err (!%p901_p0)
}
  0x74   : > { %s905_s19 = scalar_lea.vmem %s1256_s13, 64  ;;  %s1040_s9 = smov [#allocation11]  }
  0x75   : > { %p906_p10 = scmp.ne.s32.totalorder %s1256_s13, %s905_s19  ;;  %s910_s14 = sshll.u32 %s1040_s9, 4  ;;  %s911_s14 = int_to_ptr.vmem [resolvable:$false] %s910_s14 }
  0x76   : > { %s912_s2 = scalar_lea.vmem %s911_s14, 128  ;;  %p913_p1 = scmp.lt.s32.totalorder %s1256_s13, %s911_s14 }
  0x77   : > { %p908_p12 = pnand %p906_p10, %p892_p11  ;;  %p914_p2 = scmp.lt.s32.totalorder %s912_s2, %s905_s19 }
  0x79   : > { %p909_p13 = pneg %p908_p12  ;;  %p915_p4 = por %p914_p2, %p913_p1 }
  0x7b   : > { %p916_p6 = pnand %p915_p4, %p909_p13 }
  0x7d   : > { %919 = shalt.err (!%p916_p6)
}
  0x7e   : > { %753 = dma.hbm_to_vmem [thread:$0]  (!%p1260_p9), %s1254_s11, 64, %s1256_s13, %s262_s0  }
  0x7f   : > { %294 = sbr.rel (%p1126_p3) target bundleno = 204 (0xcc), region = 44  ;;  %p1500_p0 = scmp.ne.s32.totalorder (!%p1126_p3), %s1486_s30, 0 }
  0x86   : > { %981 = dma.done.wait (%p1500_p0), [#allocation5], 16  }
  0x87   : > { %983 = vsyncadd (%p1500_p0), [#allocation5], 4294967280 }
  0x88   : > { %985 = dma.done.wait (%p1500_p0), [#allocation8], 16  }
  0x89   : > { %987 = vsyncadd (%p1500_p0), [#allocation8], 4294967280 }
  0x8a   : > { %989 = dma.done.wait (%p1500_p0), [#allocation6], 32  }
  0x8b   : > { %991 = vsyncadd (%p1500_p0), [#allocation6], 4294967264 }
  0x8c   : > { %993 = dma.done.wait (%p1500_p0), [#allocation8], 64  }
  0x8d   : > { %995 = vsyncadd (%p1500_p0), [#allocation8], 4294967232  ;;  %s1308_s7 = sand.u32 1, %s1010_s22   ;;  %p1501_p1 = scmp.ne.s32.totalorder %s1494_s15, 0 }
  0x8e   : > { %s1480_s11 = sshll.u32 %s1308_s7, 2  ;;  %s313_s13 = scalar_lea.sflag [#allocation3], %s1308_s7 }
  0x8f   : > { %s316_s12 = scalar_lea.vmem [#allocation11], %s1480_s11 }
  0x90   : > { %997 = dma.done.wait (%p1501_p1), %s313_s13, 64  }
  0x91   : > { %999 = vsyncadd (%p1501_p1), %s313_s13, 4294967232 }
  0x92   : > { %321 = sfence }
  0x93   : > { %p354_p3 = scmp.lt.s32.totalorder %s1022_s25, 1  ;;  %p356_p13 = scmp.lt.s32.totalorder %s1018_s24, 1  ;;  %v364_v0 = vld [vmem:[%s316_s12] sm:$0xf]  ;;  %vm507_vm0 = vcmask 1040384   ;;  %vm509_vm1 = vcmask 1041408  }
  0x94   : > { %s362_s30 = sld [smem:[#allocation2 + %s1022_s25]]  ;;  %s1330_s4 = sshll.u32 %s1022_s25, 7  ;;  %vm511_vm2 = vcmask 1042432  }
  0x95   : > { %s355_s0 = scalar_select %p354_p3, %s1022_s25, 1 }
  0x96   : > { %s357_s1 = scalar_select %p356_p13, %s1018_s24, 1 }
  0x97   : > { %s694_s3 = sshll.u32 %s355_s0, 1  ;;  %s363_s17 = sld [smem:[#allocation7 + %s1022_s25]] }
  0x98   : > { %s359_s18 = sadd.s32 %s694_s3, %s357_s1  ;;  %s371_s10 = sld [smem:[#allocation10]] }
  0x99   : > { %s695_s19 = sshll.u32 %s359_s18, 2  ;;  %s696_s15 = sld [smem:[#allocation10 + $0x1]] }
  0x9a   : > { %s361_s2 = scalar_lea.vmem %s1473_s5, %s695_s19  ;;  %v366_v1 = vstv %s362_s30  ;;  %s697_s13 = sld [smem:[#allocation10 + $0x2]] }
  0x9b   : > { %v1327_v2 = vld [vmem:[%s361_s2] sm:$0xf]  ;;  %s698_s11 = sld [smem:[#allocation10 + $0x3]]  ;;  %v367_v3 = vmul.f32 %v366_v1, %v364_v0  ;;  %s1335_s1 = sld [smem:[#allocation10 + $0x80]] }
  0x9c   : > { %s1333_s0 = sld [smem:[#allocation9 + %s1330_s4]]  ;;  %s425_s18 = sadd.s32 1, %s1330_s4  ;;  %v430_v18 = vrot.slane %v1327_v2, 1  ;;  %v462_v0 = vrot.slane %v1327_v2, 2 }
  0x9d   : > { %v368_v4 = vstv %s363_s17  ;;  %s1337_s12 = sld [smem:[#allocation10 + $0x81]]  ;;  %s1339_s3 = sld [smem:[#allocation10 + $0x82]] }
  0x9e   : > { %v369_v5 = vmul.f32 %v368_v4, %v1327_v2  ;;  %s1342_s30 = sld [smem:[#allocation10 + $0x83]]  ;;  %v372_v6 = vstv %s371_s10  ;;  %s1345_s19 = sld [smem:[#allocation10 + $0x100]] }
  0x9f   : > { %v375_v7 = vstv %s696_s15  ;;  %s1349_s17 = sld [smem:[#allocation10 + $0x101]]  ;;  %s1351_s9 = sld [smem:[#allocation10 + $0x102]] }
  0xa0   : > { %v1347_v8 = vadd.f32 %v369_v5, %v367_v3  ;;  %v382_v9 = vstv %s697_s13  ;;  %s1353_s14 = sld [smem:[#allocation10 + $0x103]]  ;;  %s1361_s15 = sld [smem:[#allocation10 + $0x180]] }
  0xa1   : > { %v389_v10 = vstv %s698_s11  ;;  %s1359_s10 = sld [smem:[#allocation9 + %s425_s18]]  ;;  %v402_v15 = vstv %s1335_s1  ;;  %s458_s11 = sadd.s32 2, %s1330_s4 }
  0xa2   : > { %v373_v11 = vmul.f32 %v372_v6, %v1347_v8  ;;  %v376_v12 = vmul.f32 %v375_v7, %v1347_v8  ;;  %v383_v13 = vmul.f32 %v382_v9, %v1347_v8  ;;  %v390_v14 = vmul.f32 %v389_v10, %v1347_v8  ;;  %s1368_s2 = sld [smem:[#allocation10 + $0x181]]  ;;  %s1371_s13 = sld [smem:[#allocation10 + $0x182]] }
  0xa3   : > { %v405_v16 = vstv %s1337_s12  ;;  %v412_v17 = vstv %s1339_s3  ;;  %v397_v22 = vstv %s1333_s0  ;;  %v403_v23 = vmul.f32 %v402_v15, %v1347_v8  ;;  %s1377_s1 = sld [smem:[#allocation10 + $0x183]]  ;;  %s490_s12 = sadd.s32 3, %s1330_s4 }
  0xa4   : > { %v378_v19 = vrot.slane %v376_v12, 1  ;;  %v385_v20 = vrot.slane %v383_v13, 2  ;;  %v392_v21 = vrot.slane %v390_v14, 3  ;;  %v406_v24 = vmul.f32 %v405_v16, %v1347_v8  ;;  %s1382_s0 = sld [smem:[#allocation9 + %s458_s11]]  ;;  %s713_s4 = sshll.u32 %s1022_s25, 1 }
  0xa5   : > { %v413_v25 = vmul.f32 %v412_v17, %v1347_v8  ;;  %v419_v26 = vstv %s1342_s30  ;;  %v435_v29 = vstv %s1345_s19  ;;  %v438_v30 = vstv %s1349_s17  ;;  %s1394_s3 = sld [smem:[#allocation9 + %s490_s12]]  ;;  %s526_s30 = sadd.s32 %s1018_s24, %s713_s4 }
  0xa6   : > { %v380_v27 = vadd.f32 %v378_v19, %v373_v11  ;;  %v420_v28 = vmul.f32 %v419_v26, %v1347_v8  ;;  %v408_v31 = vrot.slane %v406_v24, 1  ;;  %v436_v33 = vmul.f32 %v435_v29, %v1347_v8  ;;  %s714_s18 = sshll.u32 %s526_s30, 6  ;;  %s1502_s19 = sshll.u32 %s1308_s7, 2 }
  0xa7   : > { %v415_v32 = vrot.slane %v413_v25, 2  ;;  %v439_v34 = vmul.f32 %v438_v30, %v1347_v8  ;;  %v445_v37 = vstv %s1351_s9  ;;  %v452_v38 = vstv %s1353_s14  ;;  %s353_s17 = scalar_lea.vmem [#allocation12], %s1502_s19  ;;  %s515_s24 = scalar_lea.sflag [#allocation4], %s1308_s7 }
  0xa8   : > { %v387_v35 = vadd.f32 %v385_v20, %v380_v27  ;;  %v422_v36 = vrot.slane %v420_v28, 3  ;;  %v410_v39 = vadd.f32 %v408_v31, %v403_v23  ;;  %v446_v41 = vmul.f32 %v445_v37, %v1347_v8  ;;  %s530_s9 = sshll.u32 %s353_s17, 4  ;;  %p1503_p9 = scmp.ne.s32.totalorder %s1495_s16, 0  ;;  %s1416_s9 = int_to_ptr.vmem [resolvable:$true] %s530_s9 }
  0xa9   : > { %v441_v40 = vrot.slane %v439_v34, 1  ;;  %v453_v42 = vmul.f32 %v452_v38, %v1347_v8  ;;  %v427_v44 = vstv %s1359_s10  ;;  %v467_v45 = vstv %s1361_s15  ;;  %s1414_s10 = scalar_lea.hbm %s1474_s6, %s714_s18  ;;  %s920_s15 = scalar_lea.vmem %s1416_s9, 64 }
  0xaa   : > { %v394_v43 = vadd.f32 %v392_v21, %v387_v35  ;;  %v470_v46 = vstv %s1368_s2  ;;  %v417_v47 = vadd.f32 %v415_v32, %v410_v39  ;;  %v448_v49 = vrot.slane %v446_v41, 2  ;;  %p921_p8 = scmp.ne.s32.totalorder %s1416_s9, %s920_s15  ;;  %s1041_s11 = smov [#allocation12]  }
  0xab   : > { %v443_v48 = vadd.f32 %v441_v40, %v436_v33  ;;  %v455_v50 = vrot.slane %v453_v42, 3  ;;  %v468_v52 = vmul.f32 %v467_v45, %v1347_v8  ;;  %v471_v53 = vmul.f32 %v470_v46, %v1347_v8  ;;  %s924_s2 = sshll.u32 %s1041_s11, 4  ;;  %s925_s2 = int_to_ptr.vmem [resolvable:$false] %s924_s2 }
  0xac   : > { %v398_v51 = vadd.f32 %v397_v22, %v394_v43  ;;  %v477_v54 = vstv %s1371_s13  ;;  %v424_v55 = vadd.f32 %v422_v36, %v417_v47  ;;  %v484_v58 = vstv %s1377_s1  ;;  %p922_p11 = pnand %p921_p8, %p1503_p9  ;;  %s926_s13 = scalar_lea.vmem %s925_s2, 128 }
  0xad   : > { %v450_v56 = vadd.f32 %v448_v49, %v443_v48  ;;  %v478_v57 = vmul.f32 %v477_v54, %v1347_v8  ;;  %v460_v59 = vstv %s1382_s0  ;;  %v473_v60 = vrot.slane %v471_v53, 1  ;;  %p927_p7 = scmp.lt.s32.totalorder %s1416_s9, %s925_s2  ;;  %p928_p10 = scmp.lt.s32.totalorder %s926_s13, %s920_s15 }
  0xae   : > { %v485_v61 = vmul.f32 %v484_v58, %v1347_v8  ;;  %v428_v62 = vadd.f32 %v427_v44, %v424_v55  ;;  %v399_v3 = vsub.f32 %v398_v51, %v1327_v2  ;;  %v492_v12 = vstv %s1394_s3  ;;  %p923_p5 = pneg %p922_p11 }
  0xaf   : > { %v457_v63 = vadd.f32 %v455_v50, %v450_v56  ;;  %v480_v1 = vrot.slane %v478_v57, 2  ;;  %v475_v4 = vadd.f32 %v473_v60, %v468_v52  ;;  %v494_v14 = vrot.slane %v1327_v2, 3  ;;  %p929_p12 = por %p928_p10, %p927_p7 }
  0xb0   : > { %v487_v5 = vrot.slane %v485_v61, 3  ;;  %v432_v6 = vsub.f32 %v428_v62, %v430_v18  ;;  %v400_v13 = vmul.f32 %v399_v3, %v399_v3 }
  0xb1   : > { %v461_v7 = vadd.f32 %v460_v59, %v457_v63  ;;  %v482_v9 = vadd.f32 %v480_v1, %v475_v4  ;;  %p930_p2 = pnand %p929_p12, %p923_p5 }
  0xb2   : > { %v433_v10 = vmul.f32 %v432_v6, %v432_v6 }
  0xb3   : > { %v464_v11 = vsub.f32 %v461_v7, %v462_v0  ;;  %v489_v8 = vadd.f32 %v487_v5, %v482_v9 }
  0xb4   : > { %v499_v16 = vrot.slane %v433_v10, 7 }
  0xb5   : > { %v465_v15 = vmul.f32 %v464_v11, %v464_v11  ;;  %v493_v17 = vadd.f32 %v492_v12, %v489_v8 }
  0xb6   : > { %v508_v18 = vsel %vm507_vm0, %v400_v13, %v499_v16 }
  0xb7   : > { %v502_v19 = vrot.slane %v465_v15, 6  ;;  %v496_v20 = vsub.f32 %v493_v17, %v494_v14 }
  0xb9   : > { %v497_v21 = vmul.f32 %v496_v20, %v496_v20  ;;  %v510_v22 = vsel %vm509_vm1, %v508_v18, %v502_v19 }
  0xbb   : > { %v505_v2 = vrot.slane %v497_v21, 5 }
  0xbd   : > { %v512_v23 = vsel %vm511_vm2, %v510_v22, %v505_v2 }
  0xbe   : > { %513 = vst [vmem:[%s353_s17] sm:$0xf] %v512_v23 }
  0xbf   : > { %933 = shalt.err (!%p930_p2)
}
  0xc0   : > { %s934_s7 = scalar_lea.hbm %s1414_s10, 64  ;;  %s938_s12 = scalar_lea.hbm %s1474_s6, 256 }
  0xc1   : > { %p935_p4 = scmp.ne.s32.totalorder %s1414_s10, %s934_s7  ;;  %p939_p1 = scmp.lt.u32.totalorder %s1414_s10, %s1474_s6 }
  0xc2   : > { %p940_p3 = scmp.lt.u32.totalorder %s938_s12, %s934_s7  ;;  %p942_p8 = scmp.lt.u32.totalorder %s934_s7, %s1414_s10 }
  0xc3   : > { %p936_p6 = pnand %p935_p4, %p1503_p9 }
  0xc4   : > { %p941_p13 = por %p940_p3, %p939_p1 }
  0xc5   : > { %p937_p0 = pneg %p936_p6 }
  0xc6   : > { %p943_p11 = por %p942_p8, %p941_p13 }
  0xc8   : > { %p944_p5 = pnand %p943_p11, %p937_p0 }
  0xca   : > { %947 = shalt.err (!%p944_p5)
}
  0xcb   : > { %735 = dma.vmem_to_hbm [thread:$0]  (%p1503_p9), %s1416_s9, 64, %s1414_s10, %s515_s24  }
  0xcc PF: > { %p767_p7 = scmp.ge.s32.totalorder %s1034_s28, 2  ;;  %s542_s30 = sand.u32 1, %s1006_s21  }
  0xcd   : > { %p1504_p10 = scmp.ne.s32.totalorder %s1497_s29, 0  ;;  %s543_s18 = scalar_lea.sflag [#allocation4], %s542_s30 }
  0xcf   : > { %p755_p12 = pnand %p767_p7, %p1504_p10 }
  0xd1   : > { %1001 = dma.done.wait (!%p755_p12), %s543_s18, 64  }
  0xd2   : > { %1003 = vsyncadd (!%p755_p12), %s543_s18, 4294967232  ;;  %s25_s28 = sadd.s32 1, %s1034_s28   ;;  %s1505_s16 = sld [smem:[#allocation19_spill]] }
  0xd3   : > { %p22_p2 = scmp.ge.s32.totalorder %s25_s28, 6   ;;  %s1506_s21 = smov %s1010_s22 }
  0xd4   : > { %s1507_s22 = smov %s1014_s23  ;;  %s1508_s23 = smov %s1247_s20 }
  0xd5   : > { %s1509_s24 = smov %s1026_s26  ;;  %s1510_s25 = smov %s1030_s27 }
  0xd6   : > { %s1511_s26 = smov %s1514_s8  ;;  %24 = sbr.rel (!%p22_p2) target bundleno = 16 (0x10), region = 110 }
  0xd8   : > { %s1512_s27 = smov %s1505_s16 }
  0xdd   :  { %548 = vsyncpa [#allocation3], 1 }
  0xde   :  { %550 = vsyncpa [#allocation3 + $0x1], 1 }
  0xdf   :  { %551 = vsyncpa [#allocation4], 1 }
  0xe0   :  { %553 = vsyncpa [#allocation4 + $0x1], 1 }
  0xe1   :  { %554 = vsyncpa [#allocation5], 1 }
  0xe2   :  { %556 = vsyncpa [#allocation5 + $0x1], 1 }
  0xe3   :  { %557 = vsyncpa [#allocation8], 1 }
  0xe4   :  { %558 = vsyncpa [#allocation6], 1 }
  0xe5   :  { %560 = vsyncpa [#allocation6 + $0x1], 1 }

</bundles_post_ra>
